<compile_context>
chip_gen: v6e
topology: v6e:2x2x1
jax: 0.10.0
libtpu: 0.0.40
codegen_flags: <defaults>
</compile_context>

<pallas_src>
import math
import functools

import jax
import jax.numpy as jnp
from jax.experimental import pallas as pl
from jax.experimental.pallas import tpu as pltpu


# ----------------------- Kernel 1: fused QKV projections ---------------------
def _proj_kernel(h_ref, w_ref, b_ref,
                 q_ref, k_ref, v_ref, qg_ref, kg_ref, vg_ref):
    # h_ref: (1, TS, E) bf16; w_ref: (E, 6E) bf16; b_ref: (1, 6E) f32
    E = q_ref.shape[2]
    h = h_ref[0]
    proj = jnp.dot(h, w_ref[...], preferred_element_type=jnp.float32) + b_ref[...]
    proj = proj.astype(q_ref.dtype)          # bf16 activations for the MXU
    q_ref[0] = proj[:, 0 * E:1 * E]
    k_ref[0] = proj[:, 1 * E:2 * E]
    v_ref[0] = proj[:, 2 * E:3 * E]
    qg_ref[0] = proj[:, 3 * E:4 * E]
    kg_ref[0] = proj[:, 4 * E:5 * E]
    vg_ref[0] = proj[:, 5 * E:6 * E]


# -------------- Kernel 2: windowed attention + output projection -------------
def _attn_kernel(nglob_ref, mask_k_ref, mask_q_ref,
                 q_ref, k_ref, v_ref, qg_ref, kg_ref, vg_ref,
                 wo_ref, bo_ref,
                 out_ref, ctx_ref,
                 *, num_heads, head_dim, window):
    b = pl.program_id(0)
    qt = pl.program_id(1)
    TQ = q_ref.shape[1]
    S = k_ref.shape[1]

    q = q_ref[0]                       # (TQ, E) bf16
    k = k_ref[0]                       # (S, E)  bf16
    v = v_ref[0]                       # (S, E)  bf16
    mk = mask_k_ref[0]                 # (1, S)  f32, per-key mask value
    mq = mask_q_ref[0]                 # (TQ, 1) f32, per-query mask value

    NEG = jnp.float32(-1e9)
    key_is_local = mk == 0.0
    key_is_global = mk > 0.0
    key_is_masked = mk < 0.0
    q_is_masked = mq < 0.0
    q_is_global = mq > 0.0

    # Per-tile band mask: query rows of this tile vs all key columns.
    q_start = qt * TQ
    row = jax.lax.broadcasted_iota(jnp.int32, (TQ, S), 0) + q_start
    col = jax.lax.broadcasted_iota(jnp.int32, (TQ, S), 1)
    band = jnp.abs(row - col) <= window
    allowed = jnp.logical_or(jnp.logical_and(band, key_is_local), key_is_global)

    contract_last = (((1,), (1,)), ((), ()))   # q @ k^T without materializing k.T

    # --- local (windowed + attend-to-global-keys) attention, per head --------
    for hh in range(num_heads):
        sl = slice(hh * head_dim, (hh + 1) * head_dim)
        scores = jax.lax.dot_general(q[:, sl], k[:, sl], contract_last,
                                     preferred_element_type=jnp.float32)
        scores = jnp.where(allowed, scores, NEG)
        scores = scores - jnp.max(scores, axis=-1, keepdims=True)
        e = jnp.exp(scores)
        probs = e * pl.reciprocal(jnp.sum(e, axis=-1, keepdims=True), approx=True)
        probs = jnp.where(q_is_masked, 0.0, probs)          # zero masked query rows
        ctx_ref[:, sl] = jnp.dot(probs.astype(v.dtype), v[:, sl],
                                 preferred_element_type=jnp.float32)

    # --- global-query rows: only if this batch element has global tokens -----
    @pl.when(nglob_ref[b] > 0)
    def _():
        qg = qg_ref[0]
        kg = kg_ref[0]
        vg = vg_ref[0]
        for hh in range(num_heads):
            sl = slice(hh * head_dim, (hh + 1) * head_dim)
            gs = jax.lax.dot_general(qg[:, sl], kg[:, sl], contract_last,
                                     preferred_element_type=jnp.float32)
            gs = jnp.where(key_is_masked, NEG, gs)
            gs = gs - jnp.max(gs, axis=-1, keepdims=True)
            ge = jnp.exp(gs)
            gp = ge * pl.reciprocal(jnp.sum(ge, axis=-1, keepdims=True), approx=True)
            ctx_g = jnp.dot(gp.astype(vg.dtype), vg[:, sl],
                            preferred_element_type=jnp.float32)
            ctx_ref[:, sl] = jnp.where(q_is_global, ctx_g, ctx_ref[:, sl])

    # --- fused output projection (self.output Linear), lane-dense E output ---
    out = jnp.dot(ctx_ref[...].astype(jnp.bfloat16), wo_ref[...],
                  preferred_element_type=jnp.float32) + bo_ref[...]
    out_ref[0] = out.astype(out_ref.dtype)


# --------------------------------- Wrapper -----------------------------------
def longformer_self_attention_mbart(hidden_states, attention_mask_4d, params,
                                    *, num_heads, attention_window,
                                    q_tile=None, row_tile=None):
    """Returns (attn_output, None, None) like the PyTorch module."""
    B, S, E = hidden_states.shape
    head_dim = E // num_heads
    window = attention_window // 2
    f32, bf16 = jnp.float32, jnp.bfloat16

    if q_tile is None:
        q_tile = min(S, 128)
    if row_tile is None:
        row_tile = min(S, 512)
    assert S % q_tile == 0 and (q_tile == S or q_tile % 8 == 0)
    assert S % row_tile == 0 and (row_tile == S or row_tile % 8 == 0)
    assert E == num_heads * head_dim

    # Pack q|k|v|qg|kg|vg into one (E, 6E) weight and one (1, 6E) bias.
    # The 1/sqrt(head_dim) query scale is folded into the q / qg columns (f32),
    # then the fused weight is cast to bf16 for the MXU.
    scale = 1.0 / math.sqrt(head_dim)
    w_all = jnp.concatenate(
        [params["wq"] * scale, params["wk"], params["wv"],
         params["wqg"] * scale, params["wkg"], params["wvg"]], axis=1).astype(bf16)
    b_all = jnp.concatenate(
        [params["bq"] * scale, params["bk"], params["bv"],
         params["bqg"] * scale, params["bkg"], params["bvg"]], axis=1).astype(f32)
    h_bf16 = hidden_states.astype(bf16)

    # ---- Kernel 1: fused projections, tiled over (B, S-tiles), all parallel.
    proj_block = lambda: pl.BlockSpec((1, row_tile, E), lambda b, t: (b, t, 0))
    q, k, v, qg, kg, vg = pl.pallas_call(
        _proj_kernel,
        out_shape=tuple(jax.ShapeDtypeStruct((B, S, E), bf16) for _ in range(6)),
        grid=(B, S // row_tile),
        in_specs=[
            pl.BlockSpec((1, row_tile, E), lambda b, t: (b, t, 0)),   # hidden
            pl.BlockSpec((E, 6 * E), lambda b, t: (0, 0)),            # fused W
            pl.BlockSpec((1, 6 * E), lambda b, t: (0, 0)),            # fused b
        ],
        out_specs=tuple(proj_block() for _ in range(6)),
        compiler_params=pltpu.CompilerParams(
            dimension_semantics=("parallel", "parallel")),
    )(h_bf16, w_all, b_all)

    # Mimic: attention_mask.squeeze(dim=1)[:, 0]  ->  (B, S)
    mask = attention_mask_4d[:, 0, 0, :].astype(f32)
    mask_k = mask[:, None, :]                                    # (B, 1, S)
    mask_q = mask[:, :, None]                                    # (B, S, 1)
    n_global = jnp.sum(mask > 0.0, axis=-1).astype(jnp.int32)    # (B,) SMEM scalars

    kernel = functools.partial(_attn_kernel, num_heads=num_heads,
                               head_dim=head_dim, window=window)

    # ---- Kernel 2: attention + output projection, tiled over (B, q-tiles).
    # K/V blocks have constant index over the q-tile axis (fetched once per b).
    out = pl.pallas_call(
        kernel,
        out_shape=jax.ShapeDtypeStruct((B, S, E), f32),
        grid=(B, S // q_tile),
        in_specs=[
            pl.BlockSpec(memory_space=pltpu.MemorySpace.SMEM),            # n_global
            pl.BlockSpec((1, 1, S), lambda b, t: (b, 0, 0)),              # mask (key)
            pl.BlockSpec((1, q_tile, 1), lambda b, t: (b, t, 0)),         # mask (query)
            pl.BlockSpec((1, q_tile, E), lambda b, t: (b, t, 0)),         # q tile
            pl.BlockSpec((1, S, E), lambda b, t: (b, 0, 0)),              # k
            pl.BlockSpec((1, S, E), lambda b, t: (b, 0, 0)),              # v
            pl.BlockSpec((1, q_tile, E), lambda b, t: (b, t, 0)),         # qg tile
            pl.BlockSpec((1, S, E), lambda b, t: (b, 0, 0)),              # kg
            pl.BlockSpec((1, S, E), lambda b, t: (b, 0, 0)),              # vg
            pl.BlockSpec((E, E), lambda b, t: (0, 0)),                    # wo
            pl.BlockSpec((1, E), lambda b, t: (0, 0)),                    # bo
        ],
        out_specs=pl.BlockSpec((1, q_tile, E), lambda b, t: (b, t, 0)),
        scratch_shapes=[pltpu.VMEM((q_tile, E), f32)],                    # ctx scratch
        compiler_params=pltpu.CompilerParams(
            dimension_semantics=("parallel", "parallel")),
    )(n_global, mask_k, mask_q, q, k, v, qg, kg, vg,
      params["wo"].astype(bf16), params["bo"].astype(f32))

    return out, None, None


# --------------------------- Pure-JAX reference -------------------------------
# Mirrors the kernel's dtype policy (bf16 MXU operands, f32 accumulation) so the
# comparison checks the attention math rather than bf16 rounding.
def _reference(hidden, attention_mask_4d, params, *, num_heads, attention_window):
    B, S, E = hidden.shape
    hd = E // num_heads
    w = attention_window // 2
    scale = 1.0 / math.sqrt(hd)
    bf, f32 = jnp.bfloat16, jnp.float32
    mask = attention_mask_4d[:, 0, 0, :].astype(f32)   # (B, S)
    hb = hidden.astype(bf)

    def proj(wn, bn, s=1.0):
        W = (params[wn] * s).astype(bf)
        b = (params[bn] * s).astype(f32).reshape(-1)
        y = jnp.einsum("bse,ef->bsf", hb, W, preferred_element_type=f32) + b
        return y.astype(bf)

    q = proj("wq", "bq", scale)
    k = proj("wk", "bk")
    v = proj("wv", "bv")
    qg = proj("wqg", "bqg", scale)
    kg = proj("wkg", "bkg")
    vg = proj("wvg", "bvg")

    rs = lambda x: x.reshape(B, S, num_heads, hd)
    idx = jnp.arange(S)
    band = jnp.abs(idx[:, None] - idx[None, :]) <= w
    allowed = (band[None] & (mask == 0.0)[:, None, :]) | (mask > 0.0)[:, None, :]

    scores = jnp.einsum("bqhd,bkhd->bhqk", rs(q), rs(k), preferred_element_type=f32)
    scores = jnp.where(allowed[:, None], scores, -1e9)
    probs = jax.nn.softmax(scores, axis=-1)
    probs = jnp.where((mask < 0.0)[:, None, :, None], 0.0, probs)
    ctx = jnp.einsum("bhqk,bkhd->bqhd", probs.astype(bf), rs(v),
                     preferred_element_type=f32).reshape(B, S, E)

    g_scores = jnp.einsum("bqhd,bkhd->bhqk", rs(qg), rs(kg), preferred_element_type=f32)
    g_scores = jnp.where((mask < 0.0)[:, None, None, :], -1e9, g_scores)
    g_probs = jax.nn.softmax(g_scores, axis=-1)
    ctx_g = jnp.einsum("bhqk,bkhd->bqhd", g_probs.astype(bf), rs(vg),
                       preferred_element_type=f32).reshape(B, S, E)

    ctx = jnp.where((mask > 0.0)[:, :, None], ctx_g, ctx)
    out = jnp.einsum("bse,ef->bsf", ctx.astype(bf), params["wo"].astype(bf),
                     preferred_element_type=f32) + params["bo"].reshape(-1).astype(f32)
    return out


# ----------------------------------- Main -------------------------------------
if __name__ == "__main__":
    # Small config consistent with the module: d_model=32, 4 heads, attention_window=8.
    B, S, E = 2, 16, 32
    NUM_HEADS = 4
    ATTENTION_WINDOW = 8
    Q_TILE = 8          # forces two q-tiles so the tiled band logic is exercised

    key = jax.random.PRNGKey(0)
    keys = jax.random.split(key, 16)

    def w_init(kk):
        return (0.2 * jax.random.normal(kk, (E, E))).astype(jnp.float32)

    def b_init(kk):
        return (0.1 * jax.random.normal(kk, (1, E))).astype(jnp.float32)

    params = {
        "wq": w_init(keys[0]),  "bq": b_init(keys[1]),
        "wk": w_init(keys[2]),  "bk": b_init(keys[3]),
        "wv": w_init(keys[4]),  "bv": b_init(keys[5]),
        "wqg": w_init(keys[6]), "bqg": b_init(keys[7]),
        "wkg": w_init(keys[8]), "bkg": b_init(keys[9]),
        "wvg": w_init(keys[10]), "bvg": b_init(keys[11]),
        "wo": w_init(keys[12]), "bo": b_init(keys[13]),
    }

    hidden_states = jax.random.normal(keys[14], (B, S, E), dtype=jnp.float32)

    # Longformer-style mask row: 0 = attend locally, >0 = global token, <0 = masked.
    mask_row = jnp.zeros((B, S), dtype=jnp.float32)
    mask_row = mask_row.at[0, 0].set(10000.0)          # batch 0: token 0 is global
    mask_row = mask_row.at[0, S - 2:].set(-10000.0)    # batch 0: last 2 tokens masked
    mask_row = mask_row.at[1, S - 1].set(-10000.0)     # batch 1: last token masked (no globals)
    # Module expects (B, 1, S, S) and reduces it with .squeeze(1)[:, 0].
    attention_mask_4d = jnp.broadcast_to(mask_row[:, None, None, :], (B, 1, S, S))

    attn_out, _, _ = longformer_self_attention_mbart(
        hidden_states, attention_mask_4d, params,
        num_heads=NUM_HEADS, attention_window=ATTENTION_WINDOW, q_tile=Q_TILE,
    )
    attn_out = jax.block_until_ready(attn_out)

    ref_out = _reference(
        hidden_states, attention_mask_4d, params,
        num_heads=NUM_HEADS, attention_window=ATTENTION_WINDOW,
    )

    assert attn_out.shape == (B, S, E)
    assert bool(jnp.all(jnp.isfinite(attn_out)))
    assert bool(jnp.allclose(attn_out, ref_out, rtol=2e-2, atol=2e-2)), (
        float(jnp.max(jnp.abs(attn_out - ref_out))))

    print("KERNEL_OK")
</pallas_src>

<mosaic_0001>
module attributes {stable_mosaic.version = 11 : i64} {
  func.func @_proj_kernel(%arg0: i32, %arg1: i32, %arg2: memref<1x16x32xbf16, #tpu.memory_space<vmem>>, %arg3: memref<32x192xbf16, #tpu.memory_space<vmem>>, %arg4: memref<1x192xf32, #tpu.memory_space<vmem>>, %arg5: memref<1x16x32xbf16, #tpu.memory_space<vmem>>, %arg6: memref<1x16x32xbf16, #tpu.memory_space<vmem>>, %arg7: memref<1x16x32xbf16, #tpu.memory_space<vmem>>, %arg8: memref<1x16x32xbf16, #tpu.memory_space<vmem>>, %arg9: memref<1x16x32xbf16, #tpu.memory_space<vmem>>, %arg10: memref<1x16x32xbf16, #tpu.memory_space<vmem>>) attributes {dimension_semantics = [#tpu.dimension_semantics<parallel>, #tpu.dimension_semantics<parallel>], iteration_bounds = array<i64: 2, 1>, scalar_prefetch = 0 : i64, scratch_operands = 0 : i64, tpu.core_type = #tpu.core_type<tc>, window_params = [{transform_indices = @transform_0, window_bounds = array<i64: 1, 16, 32>}, {pipeline_mode = #tpu.pipeline_mode<synchronous>, transform_indices = @transform_1, window_bounds = array<i64: 32, 192>}, {pipeline_mode = #tpu.pipeline_mode<synchronous>, transform_indices = @transform_2, window_bounds = array<i64: 1, 192>}, {transform_indices = @transform_3, window_bounds = array<i64: 1, 16, 32>}, {transform_indices = @transform_4, window_bounds = array<i64: 1, 16, 32>}, {transform_indices = @transform_5, window_bounds = array<i64: 1, 16, 32>}, {transform_indices = @transform_6, window_bounds = array<i64: 1, 16, 32>}, {transform_indices = @transform_7, window_bounds = array<i64: 1, 16, 32>}, {transform_indices = @transform_8, window_bounds = array<i64: 1, 16, 32>}]} {
    %c0 = arith.constant 0 : index
    %c0_0 = arith.constant 0 : index
    %c0_1 = arith.constant 0 : index
    %0 = vector.load %arg2[%c0, %c0_0, %c0_1] : memref<1x16x32xbf16, #tpu.memory_space<vmem>>, vector<1x16x32xbf16>
    %1 = vector.shape_cast %0 : vector<1x16x32xbf16> to vector<16x32xbf16>
    %c0_2 = arith.constant 0 : index
    %c0_3 = arith.constant 0 : index
    %2 = vector.load %arg3[%c0_2, %c0_3] : memref<32x192xbf16, #tpu.memory_space<vmem>>, vector<32x192xbf16>
    %cst = arith.constant dense<0.000000e+00> : vector<16x192xf32>
    %3 = tpu.matmul %1, %2, %cst {dimension_numbers = #tpu.dot_dimension_numbers<[1], [0], [0], [1], [0, 0, 1, 1], [], []>} : vector<16x32xbf16>, vector<32x192xbf16>, vector<16x192xf32> -> vector<16x192xf32>
    %c0_4 = arith.constant 0 : index
    %c0_5 = arith.constant 0 : index
    %4 = vector.load %arg4[%c0_4, %c0_5] : memref<1x192xf32, #tpu.memory_space<vmem>>, vector<1x192xf32>
    %5 = vector.broadcast %4 : vector<1x192xf32> to vector<16x192xf32>
    %6 = arith.addf %3, %5 : vector<16x192xf32>
    %7 = arith.truncf %6 : vector<16x192xf32> to vector<16x192xbf16>
    %8 = vector.extract_strided_slice %7 {offsets = [0, 0], sizes = [16, 32], strides = [1, 1]} : vector<16x192xbf16> to vector<16x32xbf16>
    %c0_6 = arith.constant 0 : index
    %c0_7 = arith.constant 0 : index
    %c0_8 = arith.constant 0 : index
    %9 = vector.load %arg5[%c0_6, %c0_7, %c0_8] : memref<1x16x32xbf16, #tpu.memory_space<vmem>>, vector<1x16x32xbf16>
    %10 = vector.shape_cast %9 : vector<1x16x32xbf16> to vector<16x32xbf16>
    %11 = vector.shape_cast %8 : vector<16x32xbf16> to vector<1x16x32xbf16>
    tpu.vector_store %arg5[%c0_6, %c0_7, %c0_8], %11 {strides = array<i32>} : memref<1x16x32xbf16, #tpu.memory_space<vmem>>, vector<1x16x32xbf16>,
    %12 = vector.extract_strided_slice %7 {offsets = [0, 32], sizes = [16, 32], strides = [1, 1]} : vector<16x192xbf16> to vector<16x32xbf16>
    %c0_9 = arith.constant 0 : index
    %c0_10 = arith.constant 0 : index
    %c0_11 = arith.constant 0 : index
    %13 = vector.load %arg6[%c0_9, %c0_10, %c0_11] : memref<1x16x32xbf16, #tpu.memory_space<vmem>>, vector<1x16x32xbf16>
    %14 = vector.shape_cast %13 : vector<1x16x32xbf16> to vector<16x32xbf16>
    %15 = vector.shape_cast %12 : vector<16x32xbf16> to vector<1x16x32xbf16>
    tpu.vector_store %arg6[%c0_9, %c0_10, %c0_11], %15 {strides = array<i32>} : memref<1x16x32xbf16, #tpu.memory_space<vmem>>, vector<1x16x32xbf16>,
    %16 = vector.extract_strided_slice %7 {offsets = [0, 64], sizes = [16, 32], strides = [1, 1]} : vector<16x192xbf16> to vector<16x32xbf16>
    %c0_12 = arith.constant 0 : index
    %c0_13 = arith.constant 0 : index
    %c0_14 = arith.constant 0 : index
    %17 = vector.load %arg7[%c0_12, %c0_13, %c0_14] : memref<1x16x32xbf16, #tpu.memory_space<vmem>>, vector<1x16x32xbf16>
    %18 = vector.shape_cast %17 : vector<1x16x32xbf16> to vector<16x32xbf16>
    %19 = vector.shape_cast %16 : vector<16x32xbf16> to vector<1x16x32xbf16>
    tpu.vector_store %arg7[%c0_12, %c0_13, %c0_14], %19 {strides = array<i32>} : memref<1x16x32xbf16, #tpu.memory_space<vmem>>, vector<1x16x32xbf16>,
    %20 = vector.extract_strided_slice %7 {offsets = [0, 96], sizes = [16, 32], strides = [1, 1]} : vector<16x192xbf16> to vector<16x32xbf16>
    %c0_15 = arith.constant 0 : index
    %c0_16 = arith.constant 0 : index
    %c0_17 = arith.constant 0 : index
    %21 = vector.load %arg8[%c0_15, %c0_16, %c0_17] : memref<1x16x32xbf16, #tpu.memory_space<vmem>>, vector<1x16x32xbf16>
    %22 = vector.shape_cast %21 : vector<1x16x32xbf16> to vector<16x32xbf16>
    %23 = vector.shape_cast %20 : vector<16x32xbf16> to vector<1x16x32xbf16>
    tpu.vector_store %arg8[%c0_15, %c0_16, %c0_17], %23 {strides = array<i32>} : memref<1x16x32xbf16, #tpu.memory_space<vmem>>, vector<1x16x32xbf16>,
    %24 = vector.extract_strided_slice %7 {offsets = [0, 128], sizes = [16, 32], strides = [1, 1]} : vector<16x192xbf16> to vector<16x32xbf16>
    %c0_18 = arith.constant 0 : index
    %c0_19 = arith.constant 0 : index
    %c0_20 = arith.constant 0 : index
    %25 = vector.load %arg9[%c0_18, %c0_19, %c0_20] : memref<1x16x32xbf16, #tpu.memory_space<vmem>>, vector<1x16x32xbf16>
    %26 = vector.shape_cast %25 : vector<1x16x32xbf16> to vector<16x32xbf16>
    %27 = vector.shape_cast %24 : vector<16x32xbf16> to vector<1x16x32xbf16>
    tpu.vector_store %arg9[%c0_18, %c0_19, %c0_20], %27 {strides = array<i32>} : memref<1x16x32xbf16, #tpu.memory_space<vmem>>, vector<1x16x32xbf16>,
    %28 = vector.extract_strided_slice %7 {offsets = [0, 160], sizes = [16, 32], strides = [1, 1]} : vector<16x192xbf16> to vector<16x32xbf16>
    %c0_21 = arith.constant 0 : index
    %c0_22 = arith.constant 0 : index
    %c0_23 = arith.constant 0 : index
    %29 = vector.load %arg10[%c0_21, %c0_22, %c0_23] : memref<1x16x32xbf16, #tpu.memory_space<vmem>>, vector<1x16x32xbf16>
    %30 = vector.shape_cast %29 : vector<1x16x32xbf16> to vector<16x32xbf16>
    %31 = vector.shape_cast %28 : vector<16x32xbf16> to vector<1x16x32xbf16>
    tpu.vector_store %arg10[%c0_21, %c0_22, %c0_23], %31 {strides = array<i32>} : memref<1x16x32xbf16, #tpu.memory_space<vmem>>, vector<1x16x32xbf16>,
    return
  }
  func.func @transform_0(%arg0: i32, %arg1: i32) -> (i32, i32, i32) {
    %c0_i32 = arith.constant 0 : i32
    %c0_i32_0 = arith.constant 0 : i32
    return %arg0, %arg1, %c0_i32 : i32, i32, i32
  }
  func.func @transform_1(%arg0: i32, %arg1: i32) -> (i32, i32) {
    %c0_i32 = arith.constant 0 : i32
    %c0_i32_0 = arith.constant 0 : i32
    %c0_i32_1 = arith.constant 0 : i32
    return %c0_i32, %c0_i32_0 : i32, i32
  }
  func.func @transform_2(%arg0: i32, %arg1: i32) -> (i32, i32) {
    %c0_i32 = arith.constant 0 : i32
    %c0_i32_0 = arith.constant 0 : i32
    %c0_i32_1 = arith.constant 0 : i32
    return %c0_i32, %c0_i32_0 : i32, i32
  }
  func.func @transform_3(%arg0: i32, %arg1: i32) -> (i32, i32, i32) {
    %c0_i32 = arith.constant 0 : i32
    %c0_i32_0 = arith.constant 0 : i32
    return %arg0, %arg1, %c0_i32 : i32, i32, i32
  }
  func.func @transform_4(%arg0: i32, %arg1: i32) -> (i32, i32, i32) {
    %c0_i32 = arith.constant 0 : i32
    %c0_i32_0 = arith.constant 0 : i32
    return %arg0, %arg1, %c0_i32 : i32, i32, i32
  }
  func.func @transform_5(%arg0: i32, %arg1: i32) -> (i32, i32, i32) {
    %c0_i32 = arith.constant 0 : i32
    %c0_i32_0 = arith.constant 0 : i32
    return %arg0, %arg1, %c0_i32 : i32, i32, i32
  }
  func.func @transform_6(%arg0: i32, %arg1: i32) -> (i32, i32, i32) {
    %c0_i32 = arith.constant 0 : i32
    %c0_i32_0 = arith.constant 0 : i32
    return %arg0, %arg1, %c0_i32 : i32, i32, i32
  }
  func.func @transform_7(%arg0: i32, %arg1: i32) -> (i32, i32, i32) {
    %c0_i32 = arith.constant 0 : i32
    %c0_i32_0 = arith.constant 0 : i32
    return %arg0, %arg1, %c0_i32 : i32, i32, i32
  }
  func.func @transform_8(%arg0: i32, %arg1: i32) -> (i32, i32, i32) {
    %c0_i32 = arith.constant 0 : i32
    %c0_i32_0 = arith.constant 0 : i32
    return %arg0, %arg1, %c0_i32 : i32, i32, i32
  }
}

</mosaic_0001>

<bundles_post_ra>
// kernel: tpu_custom_call.1
= control target key start
LH: loop header
LB: loop body
LE: loop exit
PB: predicated region body
PF: predicated region fallthrough
CT: control target
= control target key end

     0   :  { %s1884_s0 = inlined_call_operand.hbm [shape: bf16[2,16,32], index: 0, kind: input, shape index: {}]   ;;  %s1885_s1 = inlined_call_operand.hbm [shape: bf16[32,192], index: 1, kind: input, shape index: {}]   ;;  %s1886_s2 = inlined_call_operand.vmem [shape: f32[1,192], index: 2, kind: input, shape index: {}]   ;;  %s1887_s3 = inlined_call_operand.hbm [shape: bf16[2,16,32], index: 3, kind: output, shape index: {0}]   ;;  %s1888_s4 = inlined_call_operand.hbm [shape: bf16[2,16,32], index: 4, kind: output, shape index: {1}]   ;;  %s1889_s5 = inlined_call_operand.hbm [shape: bf16[2,16,32], index: 5, kind: output, shape index: {2}]   ;;  %s1890_s6 = inlined_call_operand.hbm [shape: bf16[2,16,32], index: 6, kind: output, shape index: {3}]   ;;  %s1891_s7 = inlined_call_operand.hbm [shape: bf16[2,16,32], index: 7, kind: output, shape index: {4}]   ;;  %s1892_s8 = inlined_call_operand.hbm [shape: bf16[2,16,32], index: 8, kind: output, shape index: {5}]  }
   0x1   :  { %1906 = sst [smem:[#allocation28_spill]] %s1884_s0 }
   0x2   :  { %1907 = sst [smem:[#allocation29_spill]] %s1885_s1 }
   0x3   :  { %1908 = sst [smem:[#allocation30_spill]] %s1886_s2 }
   0x4   :  { %1909 = sst [smem:[#allocation31_spill]] %s1887_s3 }
   0x5   :  { %14 = vsyncpa [#allocation3], 0 }
   0x6   :  { %16 = vsyncpa [#allocation3 + $0x1], 0 }
   0x7   :  { %17 = vsyncpa [#allocation6], 0 }
   0x8   :  { %18 = vsyncpa [#allocation4], 0 }
   0x9   :  { %20 = vsyncpa [#allocation4 + $0x1], 0 }
   0xa   :  { %21 = vsyncpa [#allocation9], 0 }
   0xb   :  { %23 = vsyncpa [#allocation9 + $0x1], 0 }
   0xc   :  { %24 = vsyncpa [#allocation12], 0 }
   0xd   :  { %26 = vsyncpa [#allocation12 + $0x1], 0 }
   0xe   :  { %27 = vsyncpa [#allocation15], 0 }
   0xf   :  { %29 = vsyncpa [#allocation15 + $0x1], 0  ;;  %s1476_s27 = smov 0   ;;  %s1478_s28 = smov 0  }
  0x10   :  { %s1480_s29 = smov 0   ;;  %s1482_s30 = smov 0  }
  0x11   :  { %s1484_s9 = smov 0   ;;  %s1486_s10 = smov 0  }
  0x12 LB: > { %1910 = sst [smem:[#allocation22_spill]] %s1392_s27  ;;  %s1507_s11 = sadd.s32 4294967295, %s1412_s10   ;;  %s1412_s10 = sphi %s1486_s10, %s35_s10   ;;  %s1408_s9 = sphi %s1484_s9, %s1944_s9   ;;  %s1404_s30 = sphi %s1482_s30, %s1943_s30   ;;  %s1400_s29 = sphi %s1480_s29, %s1942_s29   ;;  %s1396_s28 = sphi %s1478_s28, %s1946_s28   ;;  %s1392_s27 = sphi %s1476_s27, %s1945_s27  }
  0x13   : > { %1911 = sst [smem:[#allocation23_spill]] %s1400_s29  ;;  %s1893_s12 = sadd.s32 4294967294, %s1412_s10  }
  0x14   : > { %1912 = sst [smem:[#allocation24_spill]] %s1408_s9  ;;  %p69_p0 = scmp.ne.s32.totalorder %s1396_s28, %s1392_s27 }
  0x15   : > { %p1898_p1 = scmp.eq.s32.totalorder %s1507_s11, 0  ;;  %p143_p3 = scmp.eq.s32.totalorder %s1893_s12, 1 }
  0x16   : > { %p962_p5 = scmp.ge.s32.totalorder %s1412_s10, 1  ;;  %p290_p7 = scmp.lt.s32.totalorder %s1412_s10, 3 }
  0x17   : > { %p1518_p4 = por %p1898_p1, %p69_p0  ;;  %p1523_p6 = por %p143_p3, %p69_p0 }
  0x18   : > { %p1528_p8 = pnand %p962_p5, %p290_p7  ;;  %s1414_s16 = smov [#allocation5]  }
  0x19   : > { %s1914_s14 = scalar_select %p1523_p6, 1, 0 }
  0x1a   : > { %s302_s17 = sshll.u32 %s1414_s16, 4  ;;  %p1036_p9 = pneg %p1528_p8  ;;  %s303_s17 = int_to_ptr.vmem [resolvable:$true] %s302_s17 }
  0x1b   : > { %1915 = sst [smem:[#allocation25_spill]] %s1914_s14  ;;  %s47_s19 = sadd.s32 1, %s1408_s9 }
  0x1c   : > { %p1537_p11 = pnand %p1036_p9, %p1898_p1  ;;  %s1143_s20 = scalar_lea.vmem %s303_s17, 512 }
  0x1d   : > { %p1144_p13 = scmp.ne.s32.totalorder %s303_s17, %s1143_s20  ;;  %p1151_p5 = scmp.lt.s32.totalorder %s303_s17, %s303_s17 }
  0x1e   : > { %p1134_p12 = pneg %p1537_p11  ;;  %p1152_p7 = scmp.lt.s32.totalorder %s1143_s20, %s1143_s20 }
  0x20   : > { %p1146_p0 = pnand %p1144_p13, %p1134_p12  ;;  %p1153_p2 = por %p1152_p7, %p1151_p5 }
  0x22   : > { %p1147_p3 = pneg %p1146_p0 }
  0x24   : > { %p1154_p6 = pnand %p1153_p2, %p1147_p3 }
  0x26   : > { %1157 = shalt.err (!%p1154_p6)
}
  0x27   : > { %s1415_s21 = smov 128   ;;  %s1416_s22 = smov 8  }
  0x28   : > { %s1918_s1 = sld [smem:[#allocation29_spill]]  ;;  %p49_p2 = scmp.ge.s32.totalorder %s47_s19, 2 }
  0x29   : > { %s56_s25 = sadd.s32 1, %s1400_s29  ;;  %p63_p6 = scmp.ne.s32.totalorder %s1400_s29, %s1396_s28 }
  0x2a   : > { %p64_p9 = scmp.eq.s32.totalorder %s1412_s10, 0  ;;  %s1948_s19 = smov (%p49_p2, %s47_s19), 0 }
  0x2b   : > { %1919 = sst [smem:[#allocation26_spill]] %s1948_s19  ;;  %p1921_p13 = scmp.eq.s32.totalorder %s1507_s11, 1 }
  0x2c   : > { %p1555_p12 = por %p64_p9, %p63_p6  ;;  %s51_s18 = ssub.s32 %s1408_s9, %s1948_s19 }
  0x2d   : > { %p1561_p0 = por %p1921_p13, %p63_p6  ;;  %p1064_p3 = scmp.lt.s32.totalorder %s1412_s10, 2 }
  0x2e   : > { %1039 = dma.hbm_to_vmem [thread:$0]  (!%p1537_p11), %s1918_s1, 512, %s303_s17, [#allocation6], %s1415_s21, %s1415_s21, %s1416_s22  }
  0x2f   : > { %p54_p11 = scmp.eq.s32.totalorder %s51_s18, 0  ;;  %s319_s17 = sand.u32 1, %s1400_s29  }
  0x30   : > { %s965_s20 = sshll.u32 %s319_s17, 3  ;;  %s1007_s22 = sshll.u32 %s1408_s9, 7 }
  0x31   : > { %s1570_s21 = scalar_select %p54_p11, %s1400_s29, %s56_s25  }
  0x32   : > { %s1924_s0 = sld [smem:[#allocation28_spill]]  ;;  %s323_s1 = scalar_lea.vmem [#allocation2], %s965_s20 }
  0x33   : > { %1923 = sst [smem:[#allocation27_spill]] %s1570_s21  ;;  %s332_s14 = sshll.u32 %s323_s1, 4  ;;  %s333_s14 = int_to_ptr.vmem [resolvable:$true] %s332_s14 }
  0x34   : > { %p1578_p5 = pnand %p1064_p3, %p1555_p12  ;;  %s320_s19 = scalar_lea.sflag [#allocation3], %s319_s17 }
  0x35   : > { %s1171_s18 = scalar_lea.vmem %s333_s14, 128  ;;  %s1417_s25 = smov [#allocation2]  }
  0x36   : > { %p1160_p7 = pneg %p1578_p5  ;;  %p1172_p2 = scmp.ne.s32.totalorder %s333_s14, %s1171_s18 }
  0x37   : > { %s1176_s9 = sshll.u32 %s1417_s25, 4  ;;  %s1177_s9 = int_to_ptr.vmem [resolvable:$false] %s1176_s9 }
  0x38   : > { %s331_s12 = scalar_lea.hbm %s1924_s0, %s1007_s22  ;;  %p1174_p6 = pnand %p1172_p2, %p1160_p7 }
  0x39   : > { %s1178_s22 = scalar_lea.vmem %s1177_s9, 256  ;;  %p1179_p13 = scmp.lt.s32.totalorder %s333_s14, %s1177_s9 }
  0x3a   : > { %p1175_p9 = pneg %p1174_p6  ;;  %p1180_p11 = scmp.lt.s32.totalorder %s1178_s22, %s1171_s18 }
  0x3c   : > { %p1181_p10 = por %p1180_p11, %p1179_p13 }
  0x3e   : > { %p1182_p1 = pnand %p1181_p10, %p1175_p9 }
  0x40   : > { %1185 = shalt.err (!%p1182_p1)
}
  0x41   : > { %s1418_s1 = smov 64   ;;  %s1419_s26 = smov 4  }
  0x42   : > { %1043 = dma.hbm_to_vmem [thread:$0]  (!%p1578_p5), %s331_s12, 128, %s333_s14, %s320_s19, %s1418_s1, %s1418_s1, %s1419_s26  }
  0x43   : > { %344 = sbr.rel (%p1528_p8) target bundleno = 503 (0x1f7), region = 32  ;;  %s1589_s17 = sand.u32 (!%p1528_p8), 1, %s1396_s28  }
  0x44   : > { %s1592_s20 = sshll.u32 (!%p1528_p8), %s1589_s17, 3  ;;  %s347_s9 = scalar_lea.sflag (!%p1528_p8), [#allocation3], %s1589_s17 }
  0x45   : > { %s350_s23 = scalar_lea.vmem (!%p1528_p8), [#allocation2], %s1592_s20 }
  0x48   : > { %1367 = dma.done.wait (%p1518_p4), %s347_s9, 128  }
  0x49   : > { %1369 = vsyncadd (%p1518_p4), %s347_s9, 4294967168  ;;  %p1926_p1 = scmp.eq.s32.totalorder %s1507_s11, 0 }
  0x4b   : > { %1371 = dma.done.wait (%p1926_p1), [#allocation6], 512   ;;  %p1927_p8 = pmov %p1926_p1 }
  0x4c   : > { %v1420_v0 = vmov 0   ;;  %v1125_v1 = vld [vmem:[#allocation5 + $0x14] ss:$8 sps:$4 sm:$0xff]   ;;  %v1127_v2 = vld [vmem:[#allocation5 + $0x10] ss:$8 sps:$4 sm:$0xff]   ;;  %vm463_vm0 = vcmask 261120   ;;  %v428_v6 = vlaneseq }
  0x4d   : > { %1373 = vsyncadd (%p1927_p8), [#allocation6], 4294966784  ;;  %499 = vmatprep.mubr.bf16.mxu0 %v1420_v0  ;;  %479 = vmatprep.subr.bf16.mxu0 %v1125_v1  ;;  %v1128_v3 = vld [vmem:[#allocation5 + $0x4] ss:$8 sps:$4 sm:$0xff]   ;;  %v1130_v4 = vld [vmem:[#allocation5] ss:$8 sps:$4 sm:$0xff]  }
  0x4e   : > { %480 = vmatpush1.bf16.msra.mxu0 %v1127_v2  ;;  %v1131_v5 = vld [vmem:[%s350_s23] sm:$0xff]   ;;  %v429_v7 = vshrl.u32 %v428_v6, 7  ;;  %s1928_s2 = sld [smem:[#allocation30_spill]]  ;;  %vm519_vm1 = vcmask 257024   ;;  %s376_s13 = scalar_lea.vmem [#allocation7], %s1592_s20 }
  0x4f   : > { %481 = vmatprep.subr.bf16.mxu0 %v1128_v3  ;;  %s604_s14 = sshll.u32 %s376_s13, 4  ;;  %s1609_s15 = sshll.u32 %s1404_s30, 7  ;;  %s1624_s14 = int_to_ptr.vmem [resolvable:$true] %s604_s14 }
  0x50   : > { %v430_v8 = vsub.s32 0, %v429_v7  ;;  %v434_v10 = vsub.s32 1, %v429_v7  ;;  %s1421_s19 = smov 32   ;;  %s1899_s24 = smov 96  }
  0x51   : > { %s1614_s18 = scalar_lea.vmem [#allocation13], %s1592_s20  ;;  %s1929_s3 = sld [smem:[#allocation31_spill]] }
  0x52   : > { %482 = vmatpush1.bf16.msra.mxu0 %v1130_v4  ;;  %s1901_s1 = smov 64   ;;  %s564_s26 = scalar_lea.sflag [#allocation4], %s1589_s17 }
  0x53   : > { %s1186_s9 = scalar_lea.vmem %s1624_s14, 128  ;;  %s1424_s23 = smov [#allocation7]  }
  0x54   : > { %v426_v9 = vld [vmem:[%s1928_s2] sm:$0x3]  ;;  %p1187_p4 = scmp.ne.s32.totalorder %s1624_s14, %s1186_s9  ;;  %s1190_s27 = sshll.u32 %s1424_s23, 4  ;;  %s1191_s27 = int_to_ptr.vmem [resolvable:$false] %s1190_s27 }
  0x55   : > { %982 = vmatmul.mubr.msk.bf16.vlgmr.msra.gmra.mxu0 %vm463_vm0, %v1131_v5  ;;  %v431_v11 = vrot.slane %v426_v9, %v430_v8  ;;  %v435_v12 = vrot.slane %v426_v9, %v434_v10  ;;  %s1192_s12 = scalar_lea.vmem %s1191_s27, 256  ;;  %p1193_p3 = scmp.lt.s32.totalorder %s1624_s14, %s1191_s27 }
  0x56   : > { %p1188_p10 = pnand %p1187_p4, %p1561_p0  ;;  %p1194_p5 = scmp.lt.s32.totalorder %s1192_s12, %s1186_s9 }
  0x57   : > { %s1622_s22 = scalar_lea.hbm %s1929_s3, %s1609_s15 }
  0x58   : > { %p1189_p12 = pneg %p1188_p10  ;;  %p1195_p7 = por %p1194_p5, %p1193_p3 }
  0x5a   : > { %p1196_p2 = pnand %p1195_p7, %p1189_p12 }
 0x115   : > { %v501_v13 = vpop.f32.mrf.mxu0 }
 0x116   : > { %v502_v14 = vadd.f32 %v501_v13, %v431_v11 }
 0x117   : > { %v503_v15 = vpop.f32.mrf.mxu0 }
 0x118   : > { %v1008_v16 = vpack.c.bf16 %v502_v14, %v502_v14  ;;  %v504_v17 = vadd.f32 %v503_v15, %v435_v12 }
 0x119   : > { %v505_v18 = vpop.f32.mrf.mxu0 }
 0x11a   : > { %520 = vst.msk [vmem:[%s376_s13] sm:$0xf] %vm519_vm1, %v1008_v16  ;;  %v1010_v19 = vpack.c.bf16 %v504_v17, %v504_v17  ;;  %v506_v20 = vadd.f32 %v505_v18, %v431_v11  ;;  %538 = vrot.lane.b32.xlu1 %v1008_v16, %s1421_s19  ;;  %522 = vrot.lane.b32.xlu0 %v1008_v16, %s1899_s24 }
 0x11b   : > { %v507_v21 = vpop.f32.mrf.mxu0 }
 0x11c   : > { %553 = vst.msk [vmem:[%s1614_s18] sm:$0xf] %vm519_vm1, %v1010_v19  ;;  %v1009_v22 = vpack.c.bf16 %v506_v20, %v506_v20  ;;  %v508_v23 = vadd.f32 %v507_v21, %v435_v12 }
 0x11e   : > { %521 = vst.msk [vmem:[%s376_s13 + $0x4] sm:$0xf] %vm519_vm1, %v1009_v22  ;;  %v1011_v24 = vpack.c.bf16 %v508_v23, %v508_v23  ;;  %540 = vrot.lane.b32.xlu1 %v1009_v22, %s1421_s19  ;;  %530 = vrot.lane.b32.xlu0 %v1008_v16, %s1901_s1 }
 0x11f   : > { %1199 = shalt.err (!%p1196_p2)
}
 0x120   : > { %s1200_s13 = scalar_lea.hbm %s1622_s22, 128  ;;  %s1204_s25 = scalar_lea.hbm %s1929_s3, 256 }
 0x121   : > { %p1201_p6 = scmp.ne.s32.totalorder %s1622_s22, %s1200_s13  ;;  %p1205_p11 = scmp.lt.s32.totalorder %s1622_s22, %s1929_s3 }
 0x122   : > { %p1206_p1 = scmp.lt.s32.totalorder %s1204_s25, %s1200_s13 }
 0x123   : > { %p1202_p9 = pnand %p1201_p6, %p1561_p0 }
 0x124   : > { %p1207_p8 = por %p1206_p1, %p1205_p11 }
 0x125   : > { %p1203_p13 = pneg %p1202_p9 }
 0x127   : > { %p1208_p4 = pnand %p1207_p8, %p1203_p13 }
 0x129   : > { %1211 = shalt.err (!%p1208_p4)
}
 0x12a   : > { %s1903_s9 = smov 4   ;;  %554 = vst.msk [vmem:[%s1614_s18 + $0x4] sm:$0xf] %vm519_vm1, %v1011_v24  ;;  %532 = vrot.lane.b32.xlu1 %v1009_v22, %s1901_s1  ;;  %s1930_s24 = smov 96  }
 0x12b   : > { %1024 = dma.vmem_to_hbm [thread:$0]  (%p1561_p0), %s1624_s14, 128, %s1622_s22, %s564_s26, %s1901_s1, %s1901_s1, %s1903_s9  }
 0x12c   : > { %524 = vrot.lane.b32.xlu0 %v1009_v22, %s1930_s24  ;;  %s676_s27 = sshll.u32 %s1614_s18, 4  ;;  %s397_s12 = scalar_lea.vmem [#allocation11], %s1592_s20  ;;  %s1670_s27 = int_to_ptr.vmem [resolvable:$true] %s676_s27 }
 0x12d   : > { %s658_s13 = sshll.u32 %s397_s12, 4  ;;  %s1663_s19 = scalar_lea.vmem [#allocation8], %s1592_s20  ;;  %s1673_s13 = int_to_ptr.vmem [resolvable:$true] %s658_s13 }
 0x12e   : > { %557 = vrot.lane.b32.xlu1 %v1011_v24, %s1930_s24  ;;  %s622_s14 = sshll.u32 %s1663_s19, 4  ;;  %s1667_s22 = scalar_lea.vmem [#allocation10], %s1592_s20  ;;  %s1678_s14 = int_to_ptr.vmem [resolvable:$true] %s622_s14 }
 0x12f   : > { %s640_s26 = sshll.u32 %s1667_s22, 4  ;;  %s1686_s23 = scalar_lea.hbm %s1890_s6, %s1609_s15  ;;  %s1680_s26 = int_to_ptr.vmem [resolvable:$true] %s640_s26 }
 0x130   : > { %555 = vrot.lane.b32.xlu0 %v1010_v19, %s1930_s24  ;;  %s1689_s24 = scalar_lea.vmem [#allocation14], %s1592_s20  ;;  %s1696_s0 = scalar_lea.hbm %s1891_s7, %s1609_s15 }
 0x131   : > { %s1705_s25 = scalar_lea.hbm %s1888_s4, %s1609_s15  ;;  %s1931_s3 = sand.u32 1, %s1507_s11  }
 0x132   : > { %s1709_s21 = scalar_lea.sflag [#allocation12], %s1931_s3  ;;  %s1212_s20 = scalar_lea.vmem %s1673_s13, 128 }
 0x133   : > { %p1213_p10 = scmp.ne.s32.totalorder %s1673_s13, %s1212_s20  ;;  %s1426_s9 = smov [#allocation11]  }
 0x134   : > { %s1216_s18 = sshll.u32 %s1426_s9, 4  ;;  %s1217_s18 = int_to_ptr.vmem [resolvable:$false] %s1216_s18 }
 0x135   : > { %p1214_p12 = pnand %p1213_p10, %p1561_p0  ;;  %s1218_s1 = scalar_lea.vmem %s1217_s18, 256 }
 0x136   : > { %p1219_p5 = scmp.lt.s32.totalorder %s1673_s13, %s1217_s18  ;;  %p1220_p7 = scmp.lt.s32.totalorder %s1218_s1, %s1212_s20 }
 0x137   : > { %p1215_p3 = pneg %p1214_p12 }
 0x138   : > { %p1221_p2 = por %p1220_p7, %p1219_p5 }
 0x13a   : > { %p1222_p6 = pnand %p1221_p2, %p1215_p3 }
 0x18c   : > { %v539_v25 = vpop.permute.xlu1 %538  ;;  %v523_v26 = vpop.permute.xlu0 %522 }
 0x18d   : > { %544 = vst.msk [vmem:[%s397_s12] sm:$0xf] %vm519_vm1, %v539_v25  ;;  %528 = vst.msk [vmem:[%s1663_s19] sm:$0xf] %vm519_vm1, %v523_v26 }
 0x190   : > { %v541_v27 = vpop.permute.xlu1 %540  ;;  %v531_v28 = vpop.permute.xlu0 %530 }
 0x191   : > { %545 = vst.msk [vmem:[%s397_s12 + $0x4] sm:$0xf] %vm519_vm1, %v541_v27  ;;  %536 = vst.msk [vmem:[%s1667_s22] sm:$0xf] %vm519_vm1, %v531_v28 }
 0x192   : > { %1225 = shalt.err (!%p1222_p6)
}
 0x193   : > { %s1226_s2 = scalar_lea.hbm %s1686_s23, 128  ;;  %s1230_s30 = scalar_lea.hbm %s1890_s6, 256 }
 0x194   : > { %p1227_p9 = scmp.ne.s32.totalorder %s1686_s23, %s1226_s2  ;;  %p1231_p1 = scmp.lt.s32.totalorder %s1686_s23, %s1890_s6 }
 0x195   : > { %p1232_p8 = scmp.lt.s32.totalorder %s1230_s30, %s1226_s2 }
 0x196   : > { %p1228_p13 = pnand %p1227_p9, %p1561_p0 }
 0x197   : > { %p1233_p4 = por %p1232_p8, %p1231_p1 }
 0x198   : > { %p1229_p11 = pneg %p1228_p13 }
 0x19a   : > { %p1234_p10 = pnand %p1233_p4, %p1229_p11 }
 0x19c   : > { %1237 = shalt.err (!%p1234_p10)
}
 0x19d   : > { %s1932_s1 = smov 4   ;;  %s1933_s20 = smov 64  }
 0x19e   : > { %1027 = dma.vmem_to_hbm [thread:$0]  (%p1561_p0), %s1673_s13, 128, %s1686_s23, %s1709_s21, %s1933_s20, %s1933_s20, %s1932_s1  }
 0x19f   : > { %s1238_s18 = scalar_lea.vmem %s1670_s27, 128  ;;  %s1427_s29 = smov [#allocation13]  }
 0x1a0   : > { %p1239_p12 = scmp.ne.s32.totalorder %s1670_s27, %s1238_s18  ;;  %s1242_s2 = sshll.u32 %s1427_s29, 4  ;;  %s1243_s2 = int_to_ptr.vmem [resolvable:$false] %s1242_s2 }
 0x1a1   : > { %s1244_s3 = scalar_lea.vmem %s1243_s2, 256  ;;  %p1245_p7 = scmp.lt.s32.totalorder %s1670_s27, %s1243_s2 }
 0x1a2   : > { %p1240_p3 = pnand %p1239_p12, %p1561_p0  ;;  %p1246_p2 = scmp.lt.s32.totalorder %s1244_s3, %s1238_s18 }
 0x1a4   : > { %p1241_p5 = pneg %p1240_p3  ;;  %p1247_p6 = por %p1246_p2, %p1245_p7 }
 0x1a6   : > { %p1248_p9 = pnand %p1247_p6, %p1241_p5 }
 0x1a8   : > { %1251 = shalt.err (!%p1248_p9)
}
 0x1a9   : > { %s1252_s12 = scalar_lea.hbm %s1696_s0, 128  ;;  %s1256_s30 = scalar_lea.hbm %s1891_s7, 256 }
 0x1aa   : > { %p1253_p13 = scmp.ne.s32.totalorder %s1696_s0, %s1252_s12  ;;  %p1257_p8 = scmp.lt.s32.totalorder %s1696_s0, %s1891_s7 }
 0x1ab   : > { %p1258_p4 = scmp.lt.s32.totalorder %s1256_s30, %s1252_s12 }
 0x1ac   : > { %p1254_p11 = pnand %p1253_p13, %p1561_p0 }
 0x1ad   : > { %p1259_p10 = por %p1258_p4, %p1257_p8 }
 0x1ae   : > { %p1255_p1 = pneg %p1254_p11 }
 0x1b0   : > { %p1260_p12 = pnand %p1259_p10, %p1255_p1 }
 0x1b2   : > { %1263 = shalt.err (!%p1260_p12)
}
 0x1b3   : > { %1028 = dma.vmem_to_hbm [thread:$0]  (%p1561_p0), %s1670_s27, 128, %s1696_s0, %s1709_s21, %s1933_s20, %s1933_s20, %s1932_s1   ;;  %v533_v29 = vpop.permute.xlu1 %532  ;;  %v525_v30 = vpop.permute.xlu0 %524 }
 0x1b4   : > { %s1934_s18 = sshll.u32 %s1689_s24, 4  ;;  %s1767_s12 = scalar_lea.hbm %s1889_s5, %s1609_s15  ;;  %537 = vst.msk [vmem:[%s1667_s22 + $0x4] sm:$0xf] %vm519_vm1, %v533_v29  ;;  %529 = vst.msk [vmem:[%s1663_s19 + $0x4] sm:$0xf] %vm519_vm1, %v525_v30  ;;  %s1761_s18 = int_to_ptr.vmem [resolvable:$true] %s1934_s18 }
 0x1b5   : > { %s1777_s30 = scalar_lea.hbm %s1892_s8, %s1609_s15  ;;  %s1935_s0 = sand.u32 1, %s1507_s11  }
 0x1b6   : > { %s1781_s21 = scalar_lea.sflag [#allocation9], %s1935_s0  ;;  %s1264_s27 = scalar_lea.vmem %s1678_s14, 128 }
 0x1b7   : > { %p1265_p3 = scmp.ne.s32.totalorder %s1678_s14, %s1264_s27  ;;  %s1428_s9 = smov [#allocation8]  }
 0x1b8   : > { %s1268_s29 = sshll.u32 %s1428_s9, 4  ;;  %s1269_s29 = int_to_ptr.vmem [resolvable:$false] %s1268_s29 }
 0x1b9   : > { %p1266_p5 = pnand %p1265_p3, %p1561_p0  ;;  %s1270_s2 = scalar_lea.vmem %s1269_s29, 256 }
 0x1ba   : > { %p1271_p2 = scmp.lt.s32.totalorder %s1678_s14, %s1269_s29  ;;  %p1272_p6 = scmp.lt.s32.totalorder %s1270_s2, %s1264_s27 }
 0x1bb   : > { %p1267_p7 = pneg %p1266_p5 }
 0x1bc   : > { %p1273_p9 = por %p1272_p6, %p1271_p2 }
 0x1be   : > { %p1274_p13 = pnand %p1273_p9, %p1267_p7 }
 0x1c0   : > { %1277 = shalt.err (!%p1274_p13)
}
 0x1c1   : > { %s1278_s11 = scalar_lea.hbm %s1705_s25, 128  ;;  %s1282_s22 = scalar_lea.hbm %s1888_s4, 256 }
 0x1c2   : > { %p1279_p11 = scmp.ne.s32.totalorder %s1705_s25, %s1278_s11  ;;  %p1283_p4 = scmp.lt.s32.totalorder %s1705_s25, %s1888_s4 }
 0x1c3   : > { %p1284_p10 = scmp.lt.s32.totalorder %s1282_s22, %s1278_s11 }
 0x1c4   : > { %p1280_p1 = pnand %p1279_p11, %p1561_p0 }
 0x1c5   : > { %p1285_p12 = por %p1284_p10, %p1283_p4 }
 0x1c6   : > { %p1281_p8 = pneg %p1280_p1 }
 0x1c8   : > { %p1286_p3 = pnand %p1285_p12, %p1281_p8 }
 0x1ca   : > { %1289 = shalt.err (!%p1286_p3)
}
 0x1cb   : > { %1025 = dma.vmem_to_hbm [thread:$0]  (%p1561_p0), %s1678_s14, 128, %s1705_s25, %s1781_s21, %s1933_s20, %s1933_s20, %s1932_s1  }
 0x1cc   : > { %s1290_s23 = scalar_lea.vmem %s1680_s26, 128  ;;  %s1429_s0 = smov [#allocation10]  }
 0x1cd   : > { %p1291_p5 = scmp.ne.s32.totalorder %s1680_s26, %s1290_s23  ;;  %s1294_s27 = sshll.u32 %s1429_s0, 4  ;;  %s1295_s27 = int_to_ptr.vmem [resolvable:$false] %s1294_s27 }
 0x1ce   : > { %s1296_s9 = scalar_lea.vmem %s1295_s27, 256  ;;  %p1297_p6 = scmp.lt.s32.totalorder %s1680_s26, %s1295_s27 }
 0x1cf   : > { %p1292_p7 = pnand %p1291_p5, %p1561_p0  ;;  %p1298_p9 = scmp.lt.s32.totalorder %s1296_s9, %s1290_s23 }
 0x1d1   : > { %p1293_p2 = pneg %p1292_p7  ;;  %p1299_p13 = por %p1298_p9, %p1297_p6 }
 0x1d3   : > { %p1300_p11 = pnand %p1299_p13, %p1293_p2 }
 0x1d5   : > { %1303 = shalt.err (!%p1300_p11)
}
 0x1d6   : > { %s1304_s29 = scalar_lea.hbm %s1767_s12, 128  ;;  %s1308_s2 = scalar_lea.hbm %s1889_s5, 256 }
 0x1d7   : > { %p1305_p1 = scmp.ne.s32.totalorder %s1767_s12, %s1304_s29  ;;  %p1309_p10 = scmp.lt.s32.totalorder %s1767_s12, %s1889_s5 }
 0x1d8   : > { %p1310_p12 = scmp.lt.s32.totalorder %s1308_s2, %s1304_s29 }
 0x1d9   : > { %p1306_p8 = pnand %p1305_p1, %p1561_p0 }
 0x1da   : > { %p1311_p3 = por %p1310_p12, %p1309_p10 }
 0x1db   : > { %p1307_p4 = pneg %p1306_p8 }
 0x1dd   : > { %p1312_p5 = pnand %p1311_p3, %p1307_p4 }
 0x1df   : > { %1315 = shalt.err (!%p1312_p5)
}
 0x1e0   : > { %1026 = dma.vmem_to_hbm [thread:$0]  (%p1561_p0), %s1680_s26, 128, %s1767_s12, %s1781_s21, %s1933_s20, %s1933_s20, %s1932_s1   ;;  %v558_v31 = vpop.permute.xlu1 %557  ;;  %v556_v32 = vpop.permute.xlu0 %555 }
 0x1e1   : > { %562 = vst.msk [vmem:[%s1689_s24 + $0x4] sm:$0xf] %vm519_vm1, %v558_v31  ;;  %561 = vst.msk [vmem:[%s1689_s24] sm:$0xf] %vm519_vm1, %v556_v32  ;;  %s589_s19 = scalar_lea.sflag [#allocation15], %s1589_s17  ;;  %s1316_s22 = scalar_lea.vmem %s1761_s18, 128 }
 0x1e2   : > { %p1317_p7 = scmp.ne.s32.totalorder %s1761_s18, %s1316_s22  ;;  %s1430_s3 = smov [#allocation14]  }
 0x1e3   : > { %s1320_s13 = sshll.u32 %s1430_s3, 4  ;;  %s1321_s13 = int_to_ptr.vmem [resolvable:$false] %s1320_s13 }
 0x1e4   : > { %p1318_p2 = pnand %p1317_p7, %p1561_p0  ;;  %s1322_s23 = scalar_lea.vmem %s1321_s13, 256 }
 0x1e5   : > { %p1323_p9 = scmp.lt.s32.totalorder %s1761_s18, %s1321_s13  ;;  %p1324_p13 = scmp.lt.s32.totalorder %s1322_s23, %s1316_s22 }
 0x1e6   : > { %p1319_p6 = pneg %p1318_p2 }
 0x1e7   : > { %p1325_p11 = por %p1324_p13, %p1323_p9 }
 0x1e9   : > { %p1326_p1 = pnand %p1325_p11, %p1319_p6 }
 0x1eb   : > { %1329 = shalt.err (!%p1326_p1)
}
 0x1ec   : > { %s1330_s26 = scalar_lea.hbm %s1777_s30, 128  ;;  %s1334_s12 = scalar_lea.hbm %s1892_s8, 256 }
 0x1ed   : > { %p1331_p8 = scmp.ne.s32.totalorder %s1777_s30, %s1330_s26  ;;  %p1335_p12 = scmp.lt.s32.totalorder %s1777_s30, %s1892_s8 }
 0x1ee   : > { %p1336_p3 = scmp.lt.s32.totalorder %s1334_s12, %s1330_s26 }
 0x1ef   : > { %p1332_p4 = pnand %p1331_p8, %p1561_p0 }
 0x1f0   : > { %p1337_p5 = por %p1336_p3, %p1335_p12 }
 0x1f1   : > { %p1333_p10 = pneg %p1332_p4 }
 0x1f3   : > { %p1338_p7 = pnand %p1337_p5, %p1333_p10 }
 0x1f5   : > { %1341 = shalt.err (!%p1338_p7)
}
 0x1f6   : > { %1029 = dma.vmem_to_hbm [thread:$0]  (%p1561_p0), %s1761_s18, 128, %s1777_s30, %s589_s19, %s1933_s20, %s1933_s20, %s1932_s1  }
 0x1f7 PF: > { %s1936_s27 = sld [smem:[#allocation22_spill]]  ;;  %p1939_p6 = scmp.ge.s32.totalorder %s1412_s10, 2 }
 0x1f8   : > { %s1937_s9 = sld [smem:[#allocation25_spill]] }
 0x1fd   : > { %s709_s29 = sand.u32 1, %s1936_s27  }
 0x1fe   : > { %p1938_p2 = scmp.ne.s32.totalorder %s1937_s9, 0  ;;  %s710_s14 = scalar_lea.sflag [#allocation4], %s709_s29 }
 0x200   : > { %p1045_p9 = pnand %p1939_p6, %p1938_p2 }
 0x202   : > { %p1046_p13 = pneg %p1045_p9 }
 0x204   : > { %1375 = dma.done.wait (%p1046_p13), %s710_s14, 128  }
 0x205   : > { %1377 = vsyncadd (%p1046_p13), %s710_s14, 4294967168  ;;  %s1940_s16 = sadd.s32 4294967294, %s1412_s10  }
 0x206   : > { %s718_s25 = sand.u32 1, %s1940_s16  }
 0x207   : > { %s719_s2 = scalar_lea.sflag [#allocation9], %s718_s25 }
 0x208   : > { %1379 = dma.done.wait (%p1046_p13), %s719_s2, 256  }
 0x209   : > { %1381 = vsyncadd (%p1046_p13), %s719_s2, 4294967040  ;;  %s737_s11 = scalar_lea.sflag [#allocation12], %s718_s25 }
 0x20a   : > { %1383 = dma.done.wait (%p1046_p13), %s737_s11, 256  }
 0x20b   : > { %1385 = vsyncadd (%p1046_p13), %s737_s11, 4294967040  ;;  %s755_s1 = scalar_lea.sflag [#allocation15], %s709_s29 }
 0x20c   : > { %1387 = dma.done.wait (%p1046_p13), %s755_s1, 128  }
 0x20d   : > { %1389 = vsyncadd (%p1046_p13), %s755_s1, 4294967168  ;;  %s35_s10 = sadd.s32 1, %s1412_s10   ;;  %s1941_s20 = sld [smem:[#allocation23_spill]] }
 0x20e   : > { %p32_p0 = scmp.ge.s32.totalorder %s35_s10, 4   ;;  %s1942_s29 = sld [smem:[#allocation27_spill]] }
 0x20f   : > { %s1943_s30 = sld [smem:[#allocation24_spill]]  ;;  %s1945_s27 = smov %s1396_s28 }
 0x210   : > { %s1944_s9 = sld [smem:[#allocation26_spill]]  ;;  %34 = sbr.rel (!%p32_p0) target bundleno = 18 (0x12), region = 162 }
 0x213   : > { %s1946_s28 = smov %s1941_s20 }
 0x215   :  { %760 = vsyncpa [#allocation3], 1 }
 0x216   :  { %762 = vsyncpa [#allocation3 + $0x1], 1 }
 0x217   :  { %763 = vsyncpa [#allocation6], 1 }
 0x218   :  { %764 = vsyncpa [#allocation4], 1 }
 0x219   :  { %766 = vsyncpa [#allocation4 + $0x1], 1 }
 0x21a   :  { %767 = vsyncpa [#allocation9], 1 }
 0x21b   :  { %769 = vsyncpa [#allocation9 + $0x1], 1 }
 0x21c   :  { %770 = vsyncpa [#allocation12], 1 }
 0x21d   :  { %772 = vsyncpa [#allocation12 + $0x1], 1 }
 0x21e   :  { %773 = vsyncpa [#allocation15], 1 }
 0x21f   :  { %775 = vsyncpa [#allocation15 + $0x1], 1 }

</bundles_post_ra>
